<compile_context>
chip_gen: v6e
topology: v6e:2x2x1
jax: 0.10.0
libtpu: 0.0.40
codegen_flags: <defaults>
</compile_context>

<pallas_src>
import functools

import jax
import jax.numpy as jnp
from jax.experimental import pallas as pl
from jax.experimental.pallas import tpu as pltpu


def _conv_bn_relu_kernel(x_ref, w_ref, b_ref, o_ref, *, H, W, KH, KW, P,
                         Cin, Cout, relu6):
    """One grid step == one batch element.

    x_ref: (1, Cin, L)         flattened spatial + halo zeros, L = H*W + 2*(P*W+P)
    w_ref: (KH*KW, Cout, Cin)  BN-scale-folded conv taps
    b_ref: (Cout, 1)           folded BN bias (beta - mean*scale)
    o_ref: (1, Cout, H*W)      output, NCHW with spatial flattened (lane-dense)
    """
    HW = H * W

    # Accumulate in vregs; start from the folded BN bias (broadcast over lanes).
    acc = jnp.broadcast_to(b_ref[...], (Cout, HW)).astype(jnp.float32)

    # Lane masks for horizontal (row-wrap) out-of-range taps; depend on kw only.
    col = jax.lax.broadcasted_iota(jnp.int32, (Cin, HW), 1) % W
    kw_masks = []
    for kw in range(KW):
        lo, hi = P - kw, W + P - kw
        kw_masks.append(((col >= lo) & (col < hi)) if (lo > 0 or hi < W) else None)

    # Direct convolution: each tap is a static lane-shifted slice of the flat
    # input contracted on Cin against one (Cout, Cin) weight slab on the MXU.
    for kh in range(KH):
        for kw in range(KW):
            off = kh * W + kw                        # static lane offset
            slab = x_ref[0, :, off:off + HW]         # (Cin, HW)
            if kw_masks[kw] is not None:
                slab = jnp.where(kw_masks[kw], slab, 0.0)
            w_tap = w_ref[kh * KW + kw]              # (Cout, Cin)
            acc = acc + jax.lax.dot_general(
                w_tap, slab,
                dimension_numbers=(((1,), (0,)), ((), ())),
                preferred_element_type=jnp.float32)  # (Cout, HW)

    # Fused ReLU / ReLU6 (BN already folded into weights + acc init).
    y = jnp.maximum(acc, 0.0)
    if relu6:
        y = jnp.minimum(y, 6.0)
    o_ref[...] = y[None].astype(o_ref.dtype)


def conv_bn_relu(x_nchw, weight, gamma, beta, running_mean, running_var,
                 *, stride=1, padding=1, dilation=1, groups=1, eps=1e-5,
                 relu6=False):
    """Forward of _ConvBNReLU (BatchNorm in eval mode, folded into conv).

    x_nchw: (N, Cin, H, W) float32
    weight: (Cout, Cin, KH, KW) float32 (PyTorch layout)
    returns (N, Cout, H, W) float32 (NCHW, emitted directly by the kernel)
    """
    N, Cin, H, W = x_nchw.shape
    Cout, Cin_w, KH, KW = weight.shape
    assert Cin_w == Cin
    assert stride == 1, "kernel specialized for stride=1"
    assert dilation == 1, "kernel specialized for dilation=1"
    assert groups == 1, "kernel specialized for groups=1"
    assert KH - 1 == 2 * padding and KW - 1 == 2 * padding, \
        "kernel specialized for 'same'-size output (2*padding == kernel_size-1)"

    Hout, Wout = H, W
    HW = Hout * Wout
    pad_flat = padding * W + padding
    L = HW + 2 * pad_flat

    # Flatten spatial (free, contiguous) and add the combined halo zeros.
    x_flat = jnp.pad(x_nchw.reshape(N, Cin, HW),
                     ((0, 0), (0, 0), (pad_flat, pad_flat)))

    # Fold eval-mode BN into the conv weights + a single bias vector.
    scale = gamma / jnp.sqrt(running_var + eps)                  # (Cout,)
    bias = (beta - running_mean * scale).reshape(Cout, 1)        # (Cout, 1)
    w_folded = weight * scale[:, None, None, None]               # (Cout,Cin,KH,KW)
    w_taps = jnp.transpose(w_folded, (2, 3, 0, 1)).reshape(KH * KW, Cout, Cin)

    kernel = functools.partial(
        _conv_bn_relu_kernel, H=Hout, W=Wout, KH=KH, KW=KW, P=padding,
        Cin=Cin, Cout=Cout, relu6=relu6)

    out = pl.pallas_call(
        kernel,
        out_shape=jax.ShapeDtypeStruct((N, Cout, HW), x_nchw.dtype),
        grid_spec=pltpu.PrefetchScalarGridSpec(
            num_scalar_prefetch=0,
            grid=(N,),
            in_specs=[
                pl.BlockSpec((1, Cin, L), lambda n: (n, 0, 0)),
                pl.BlockSpec((KH * KW, Cout, Cin), lambda n: (0, 0, 0)),
                pl.BlockSpec((Cout, 1), lambda n: (0, 0)),
            ],
            out_specs=pl.BlockSpec((1, Cout, HW), lambda n: (n, 0, 0)),
        ),
        compiler_params=pltpu.CompilerParams(
            dimension_semantics=("parallel",)),
    )(x_flat, w_taps, bias)

    # Contiguous reshape back to NCHW -- no transpose needed.
    return out.reshape(N, Cout, Hout, Wout)


if __name__ == "__main__":
    key = jax.random.PRNGKey(0)
    k_x, k_w, k_g, k_b, k_m, k_v = jax.random.split(key, 6)

    N, Cin, H, W = 2, 4, 16, 16
    Cout, KH, KW = 8, 3, 3

    x = jax.random.normal(k_x, (N, Cin, H, W), dtype=jnp.float32)
    weight = jax.random.normal(k_w, (Cout, Cin, KH, KW), dtype=jnp.float32) * 0.1
    gamma = 1.0 + 0.1 * jax.random.normal(k_g, (Cout,), dtype=jnp.float32)
    beta = 0.1 * jax.random.normal(k_b, (Cout,), dtype=jnp.float32)
    running_mean = 0.05 * jax.random.normal(k_m, (Cout,), dtype=jnp.float32)
    running_var = jnp.abs(1.0 + 0.1 * jax.random.normal(k_v, (Cout,), dtype=jnp.float32))

    out = conv_bn_relu(x, weight, gamma, beta, running_mean, running_var,
                       stride=1, padding=1, eps=1e-5, relu6=False)
    jax.block_until_ready(out)

    # Reference check against plain JAX (same math).
    ref = jax.lax.conv_general_dilated(
        x, weight, window_strides=(1, 1), padding=((1, 1), (1, 1)),
        dimension_numbers=("NCHW", "OIHW", "NCHW"))
    scale = gamma / jnp.sqrt(running_var + 1e-5)
    ref = ref * scale[None, :, None, None] + (beta - running_mean * scale)[None, :, None, None]
    ref = jnp.maximum(ref, 0.0)
    assert out.shape == (N, Cout, H, W), out.shape
    assert jnp.allclose(out, ref, atol=1e-4, rtol=1e-4)

    print("KERNEL_OK")
</pallas_src>

<mosaic_0001>
module attributes {stable_mosaic.version = 11 : i64} {
  func.func @_conv_bn_relu_kernel(%arg0: i32, %arg1: memref<1x4x290xf32, #tpu.memory_space<vmem>>, %arg2: memref<9x8x4xf32, #tpu.memory_space<vmem>>, %arg3: memref<8x1xf32, #tpu.memory_space<vmem>>, %arg4: memref<1x8x256xf32, #tpu.memory_space<vmem>>) attributes {dimension_semantics = [#tpu.dimension_semantics<parallel>], iteration_bounds = array<i64: 2>, scalar_prefetch = 0 : i64, scratch_operands = 0 : i64, tpu.core_type = #tpu.core_type<tc>, window_params = [{transform_indices = @transform_0, window_bounds = array<i64: 1, 4, 290>}, {pipeline_mode = #tpu.pipeline_mode<synchronous>, transform_indices = @transform_1, window_bounds = array<i64: 9, 8, 4>}, {pipeline_mode = #tpu.pipeline_mode<synchronous>, transform_indices = @transform_2, window_bounds = array<i64: 8, 1>}, {transform_indices = @transform_3, window_bounds = array<i64: 1, 8, 256>}]} {
    %c0 = arith.constant 0 : index
    %c0_0 = arith.constant 0 : index
    %0 = vector.load %arg3[%c0, %c0_0] : memref<8x1xf32, #tpu.memory_space<vmem>>, vector<8x1xf32>
    %1 = vector.shape_cast %0 : vector<8x1xf32> to vector<8x1xf32>
    %2 = vector.broadcast %1 : vector<8x1xf32> to vector<8x256xf32>
    %3 = tpu.iota {dimensions = array<i32: 1>} : vector<4x256xi32>
    %c16_i32 = arith.constant 16 : i32
    %c0_i32 = arith.constant 0 : i32
    %4 = arith.cmpi eq, %c16_i32, %c0_i32 : i32
    %c1_i32 = arith.constant 1 : i32
    %5 = arith.select %4, %c1_i32, %c16_i32 : i32
    %6 = vector.broadcast %5 : i32 to vector<4x256xi32>
    %7 = arith.remsi %3, %6 : vector<4x256xi32>
    %c0_i32_1 = arith.constant 0 : i32
    %8 = vector.broadcast %c0_i32_1 : i32 to vector<4x256xi32>
    %9 = arith.cmpi ne, %7, %8 : vector<4x256xi32>
    %c0_i32_2 = arith.constant 0 : i32
    %10 = vector.broadcast %c0_i32_2 : i32 to vector<4x256xi32>
    %11 = arith.cmpi slt, %7, %10 : vector<4x256xi32>
    %c0_i32_3 = arith.constant 0 : i32
    %12 = arith.cmpi slt, %5, %c0_i32_3 : i32
    %13 = vector.broadcast %12 : i1 to vector<4x256xi1>
    %14 = vector.broadcast %13 : vector<4x256xi1> to vector<4x256xi1>
    %15 = arith.xori %11, %14 : vector<4x256xi1>
    %16 = arith.andi %15, %9 : vector<4x256xi1>
    %17 = vector.broadcast %5 : i32 to vector<4x256xi32>
    %18 = arith.addi %7, %17 : vector<4x256xi32>
    %19 = arith.select %16, %18, %7 : vector<4x256xi1>, vector<4x256xi32>
    %c1_i32_4 = arith.constant 1 : i32
    %20 = vector.broadcast %c1_i32_4 : i32 to vector<4x256xi32>
    %21 = arith.cmpi sge, %19, %20 : vector<4x256xi32>
    %c17_i32 = arith.constant 17 : i32
    %22 = vector.broadcast %c17_i32 : i32 to vector<4x256xi32>
    %23 = arith.cmpi slt, %19, %22 : vector<4x256xi32>
    %24 = arith.andi %21, %23 : vector<4x256xi1>
    %c-1_i32 = arith.constant -1 : i32
    %25 = vector.broadcast %c-1_i32 : i32 to vector<4x256xi32>
    %26 = arith.cmpi sge, %19, %25 : vector<4x256xi32>
    %c15_i32 = arith.constant 15 : i32
    %27 = vector.broadcast %c15_i32 : i32 to vector<4x256xi32>
    %28 = arith.cmpi slt, %19, %27 : vector<4x256xi32>
    %29 = arith.andi %26, %28 : vector<4x256xi1>
    %c0_5 = arith.constant 0 : index
    %c0_6 = arith.constant 0 : index
    %c0_7 = arith.constant 0 : index
    %30 = vector.load %arg1[%c0_5, %c0_6, %c0_7] : memref<1x4x290xf32, #tpu.memory_space<vmem>>, vector<1x4x256xf32>
    %31 = vector.shape_cast %30 : vector<1x4x256xf32> to vector<4x256xf32>
    %cst = arith.constant 0.000000e+00 : f32
    %32 = vector.broadcast %cst : f32 to vector<4x256xf32>
    %33 = arith.select %24, %31, %32 : vector<4x256xi1>, vector<4x256xf32>
    %c0_8 = arith.constant 0 : index
    %c0_9 = arith.constant 0 : index
    %c0_10 = arith.constant 0 : index
    %34 = vector.load %arg2[%c0_8, %c0_9, %c0_10] : memref<9x8x4xf32, #tpu.memory_space<vmem>>, vector<1x8x4xf32>
    %35 = vector.shape_cast %34 : vector<1x8x4xf32> to vector<8x4xf32>
    %cst_11 = arith.constant dense<0.000000e+00> : vector<8x256xf32>
    %36 = tpu.matmul %35, %33, %cst_11 {dimension_numbers = #tpu.dot_dimension_numbers<[1], [0], [0], [1], [0, 0, 1, 1], [], []>} : vector<8x4xf32>, vector<4x256xf32>, vector<8x256xf32> -> vector<8x256xf32>
    %37 = arith.addf %2, %36 : vector<8x256xf32>
    %c0_12 = arith.constant 0 : index
    %c0_13 = arith.constant 0 : index
    %c1 = arith.constant 1 : index
    %38 = vector.load %arg1[%c0_12, %c0_13, %c1] : memref<1x4x290xf32, #tpu.memory_space<vmem>>, vector<1x4x256xf32>
    %39 = vector.shape_cast %38 : vector<1x4x256xf32> to vector<4x256xf32>
    %c1_14 = arith.constant 1 : index
    %c0_15 = arith.constant 0 : index
    %c0_16 = arith.constant 0 : index
    %40 = vector.load %arg2[%c1_14, %c0_15, %c0_16] : memref<9x8x4xf32, #tpu.memory_space<vmem>>, vector<1x8x4xf32>
    %41 = vector.shape_cast %40 : vector<1x8x4xf32> to vector<8x4xf32>
    %cst_17 = arith.constant dense<0.000000e+00> : vector<8x256xf32>
    %42 = tpu.matmul %41, %39, %cst_17 {dimension_numbers = #tpu.dot_dimension_numbers<[1], [0], [0], [1], [0, 0, 1, 1], [], []>} : vector<8x4xf32>, vector<4x256xf32>, vector<8x256xf32> -> vector<8x256xf32>
    %43 = arith.addf %37, %42 : vector<8x256xf32>
    %c0_18 = arith.constant 0 : index
    %c0_19 = arith.constant 0 : index
    %c2 = arith.constant 2 : index
    %44 = vector.load %arg1[%c0_18, %c0_19, %c2] : memref<1x4x290xf32, #tpu.memory_space<vmem>>, vector<1x4x256xf32>
    %45 = vector.shape_cast %44 : vector<1x4x256xf32> to vector<4x256xf32>
    %cst_20 = arith.constant 0.000000e+00 : f32
    %46 = vector.broadcast %cst_20 : f32 to vector<4x256xf32>
    %47 = arith.select %29, %45, %46 : vector<4x256xi1>, vector<4x256xf32>
    %c2_21 = arith.constant 2 : index
    %c0_22 = arith.constant 0 : index
    %c0_23 = arith.constant 0 : index
    %48 = vector.load %arg2[%c2_21, %c0_22, %c0_23] : memref<9x8x4xf32, #tpu.memory_space<vmem>>, vector<1x8x4xf32>
    %49 = vector.shape_cast %48 : vector<1x8x4xf32> to vector<8x4xf32>
    %cst_24 = arith.constant dense<0.000000e+00> : vector<8x256xf32>
    %50 = tpu.matmul %49, %47, %cst_24 {dimension_numbers = #tpu.dot_dimension_numbers<[1], [0], [0], [1], [0, 0, 1, 1], [], []>} : vector<8x4xf32>, vector<4x256xf32>, vector<8x256xf32> -> vector<8x256xf32>
    %51 = arith.addf %43, %50 : vector<8x256xf32>
    %c0_25 = arith.constant 0 : index
    %c0_26 = arith.constant 0 : index
    %c16 = arith.constant 16 : index
    %52 = vector.load %arg1[%c0_25, %c0_26, %c16] : memref<1x4x290xf32, #tpu.memory_space<vmem>>, vector<1x4x256xf32>
    %53 = vector.shape_cast %52 : vector<1x4x256xf32> to vector<4x256xf32>
    %cst_27 = arith.constant 0.000000e+00 : f32
    %54 = vector.broadcast %cst_27 : f32 to vector<4x256xf32>
    %55 = arith.select %24, %53, %54 : vector<4x256xi1>, vector<4x256xf32>
    %c3 = arith.constant 3 : index
    %c0_28 = arith.constant 0 : index
    %c0_29 = arith.constant 0 : index
    %56 = vector.load %arg2[%c3, %c0_28, %c0_29] : memref<9x8x4xf32, #tpu.memory_space<vmem>>, vector<1x8x4xf32>
    %57 = vector.shape_cast %56 : vector<1x8x4xf32> to vector<8x4xf32>
    %cst_30 = arith.constant dense<0.000000e+00> : vector<8x256xf32>
    %58 = tpu.matmul %57, %55, %cst_30 {dimension_numbers = #tpu.dot_dimension_numbers<[1], [0], [0], [1], [0, 0, 1, 1], [], []>} : vector<8x4xf32>, vector<4x256xf32>, vector<8x256xf32> -> vector<8x256xf32>
    %59 = arith.addf %51, %58 : vector<8x256xf32>
    %c0_31 = arith.constant 0 : index
    %c0_32 = arith.constant 0 : index
    %c17 = arith.constant 17 : index
    %60 = vector.load %arg1[%c0_31, %c0_32, %c17] : memref<1x4x290xf32, #tpu.memory_space<vmem>>, vector<1x4x256xf32>
    %61 = vector.shape_cast %60 : vector<1x4x256xf32> to vector<4x256xf32>
    %c4 = arith.constant 4 : index
    %c0_33 = arith.constant 0 : index
    %c0_34 = arith.constant 0 : index
    %62 = vector.load %arg2[%c4, %c0_33, %c0_34] : memref<9x8x4xf32, #tpu.memory_space<vmem>>, vector<1x8x4xf32>
    %63 = vector.shape_cast %62 : vector<1x8x4xf32> to vector<8x4xf32>
    %cst_35 = arith.constant dense<0.000000e+00> : vector<8x256xf32>
    %64 = tpu.matmul %63, %61, %cst_35 {dimension_numbers = #tpu.dot_dimension_numbers<[1], [0], [0], [1], [0, 0, 1, 1], [], []>} : vector<8x4xf32>, vector<4x256xf32>, vector<8x256xf32> -> vector<8x256xf32>
    %65 = arith.addf %59, %64 : vector<8x256xf32>
    %c0_36 = arith.constant 0 : index
    %c0_37 = arith.constant 0 : index
    %c18 = arith.constant 18 : index
    %66 = vector.load %arg1[%c0_36, %c0_37, %c18] : memref<1x4x290xf32, #tpu.memory_space<vmem>>, vector<1x4x256xf32>
    %67 = vector.shape_cast %66 : vector<1x4x256xf32> to vector<4x256xf32>
    %cst_38 = arith.constant 0.000000e+00 : f32
    %68 = vector.broadcast %cst_38 : f32 to vector<4x256xf32>
    %69 = arith.select %29, %67, %68 : vector<4x256xi1>, vector<4x256xf32>
    %c5 = arith.constant 5 : index
    %c0_39 = arith.constant 0 : index
    %c0_40 = arith.constant 0 : index
    %70 = vector.load %arg2[%c5, %c0_39, %c0_40] : memref<9x8x4xf32, #tpu.memory_space<vmem>>, vector<1x8x4xf32>
    %71 = vector.shape_cast %70 : vector<1x8x4xf32> to vector<8x4xf32>
    %cst_41 = arith.constant dense<0.000000e+00> : vector<8x256xf32>
    %72 = tpu.matmul %71, %69, %cst_41 {dimension_numbers = #tpu.dot_dimension_numbers<[1], [0], [0], [1], [0, 0, 1, 1], [], []>} : vector<8x4xf32>, vector<4x256xf32>, vector<8x256xf32> -> vector<8x256xf32>
    %73 = arith.addf %65, %72 : vector<8x256xf32>
    %c0_42 = arith.constant 0 : index
    %c0_43 = arith.constant 0 : index
    %c32 = arith.constant 32 : index
    %74 = vector.load %arg1[%c0_42, %c0_43, %c32] : memref<1x4x290xf32, #tpu.memory_space<vmem>>, vector<1x4x256xf32>
    %75 = vector.shape_cast %74 : vector<1x4x256xf32> to vector<4x256xf32>
    %cst_44 = arith.constant 0.000000e+00 : f32
    %76 = vector.broadcast %cst_44 : f32 to vector<4x256xf32>
    %77 = arith.select %24, %75, %76 : vector<4x256xi1>, vector<4x256xf32>
    %c6 = arith.constant 6 : index
    %c0_45 = arith.constant 0 : index
    %c0_46 = arith.constant 0 : index
    %78 = vector.load %arg2[%c6, %c0_45, %c0_46] : memref<9x8x4xf32, #tpu.memory_space<vmem>>, vector<1x8x4xf32>
    %79 = vector.shape_cast %78 : vector<1x8x4xf32> to vector<8x4xf32>
    %cst_47 = arith.constant dense<0.000000e+00> : vector<8x256xf32>
    %80 = tpu.matmul %79, %77, %cst_47 {dimension_numbers = #tpu.dot_dimension_numbers<[1], [0], [0], [1], [0, 0, 1, 1], [], []>} : vector<8x4xf32>, vector<4x256xf32>, vector<8x256xf32> -> vector<8x256xf32>
    %81 = arith.addf %73, %80 : vector<8x256xf32>
    %c0_48 = arith.constant 0 : index
    %c0_49 = arith.constant 0 : index
    %c33 = arith.constant 33 : index
    %82 = vector.load %arg1[%c0_48, %c0_49, %c33] : memref<1x4x290xf32, #tpu.memory_space<vmem>>, vector<1x4x256xf32>
    %83 = vector.shape_cast %82 : vector<1x4x256xf32> to vector<4x256xf32>
    %c7 = arith.constant 7 : index
    %c0_50 = arith.constant 0 : index
    %c0_51 = arith.constant 0 : index
    %84 = vector.load %arg2[%c7, %c0_50, %c0_51] : memref<9x8x4xf32, #tpu.memory_space<vmem>>, vector<1x8x4xf32>
    %85 = vector.shape_cast %84 : vector<1x8x4xf32> to vector<8x4xf32>
    %cst_52 = arith.constant dense<0.000000e+00> : vector<8x256xf32>
    %86 = tpu.matmul %85, %83, %cst_52 {dimension_numbers = #tpu.dot_dimension_numbers<[1], [0], [0], [1], [0, 0, 1, 1], [], []>} : vector<8x4xf32>, vector<4x256xf32>, vector<8x256xf32> -> vector<8x256xf32>
    %87 = arith.addf %81, %86 : vector<8x256xf32>
    %c0_53 = arith.constant 0 : index
    %c0_54 = arith.constant 0 : index
    %c34 = arith.constant 34 : index
    %88 = vector.load %arg1[%c0_53, %c0_54, %c34] : memref<1x4x290xf32, #tpu.memory_space<vmem>>, vector<1x4x256xf32>
    %89 = vector.shape_cast %88 : vector<1x4x256xf32> to vector<4x256xf32>
    %cst_55 = arith.constant 0.000000e+00 : f32
    %90 = vector.broadcast %cst_55 : f32 to vector<4x256xf32>
    %91 = arith.select %29, %89, %90 : vector<4x256xi1>, vector<4x256xf32>
    %c8 = arith.constant 8 : index
    %c0_56 = arith.constant 0 : index
    %c0_57 = arith.constant 0 : index
    %92 = vector.load %arg2[%c8, %c0_56, %c0_57] : memref<9x8x4xf32, #tpu.memory_space<vmem>>, vector<1x8x4xf32>
    %93 = vector.shape_cast %92 : vector<1x8x4xf32> to vector<8x4xf32>
    %cst_58 = arith.constant dense<0.000000e+00> : vector<8x256xf32>
    %94 = tpu.matmul %93, %91, %cst_58 {dimension_numbers = #tpu.dot_dimension_numbers<[1], [0], [0], [1], [0, 0, 1, 1], [], []>} : vector<8x4xf32>, vector<4x256xf32>, vector<8x256xf32> -> vector<8x256xf32>
    %95 = arith.addf %87, %94 : vector<8x256xf32>
    %cst_59 = arith.constant 0.000000e+00 : f32
    %96 = vector.broadcast %cst_59 : f32 to vector<8x256xf32>
    %97 = arith.maximumf %95, %96 : vector<8x256xf32>
    %98 = vector.shape_cast %97 : vector<8x256xf32> to vector<1x8x256xf32>
    %c0_60 = arith.constant 0 : index
    %c0_61 = arith.constant 0 : index
    %c0_62 = arith.constant 0 : index
    %99 = vector.load %arg4[%c0_60, %c0_61, %c0_62] : memref<1x8x256xf32, #tpu.memory_space<vmem>>, vector<1x8x256xf32>
    tpu.vector_store %arg4[%c0_60, %c0_61, %c0_62], %98 {strides = array<i32>} : memref<1x8x256xf32, #tpu.memory_space<vmem>>, vector<1x8x256xf32>,
    return
  }
  func.func @transform_0(%arg0: i32) -> (i32, i32, i32) {
    %c0_i32 = arith.constant 0 : i32
    %c0_i32_0 = arith.constant 0 : i32
    %c0_i32_1 = arith.constant 0 : i32
    return %arg0, %c0_i32, %c0_i32_0 : i32, i32, i32
  }
  func.func @transform_1(%arg0: i32) -> (i32, i32, i32) {
    %c0_i32 = arith.constant 0 : i32
    %c0_i32_0 = arith.constant 0 : i32
    %c0_i32_1 = arith.constant 0 : i32
    %c0_i32_2 = arith.constant 0 : i32
    return %c0_i32, %c0_i32_0, %c0_i32_1 : i32, i32, i32
  }
  func.func @transform_2(%arg0: i32) -> (i32, i32) {
    %c0_i32 = arith.constant 0 : i32
    %c0_i32_0 = arith.constant 0 : i32
    %c0_i32_1 = arith.constant 0 : i32
    return %c0_i32, %c0_i32_0 : i32, i32
  }
  func.func @transform_3(%arg0: i32) -> (i32, i32, i32) {
    %c0_i32 = arith.constant 0 : i32
    %c0_i32_0 = arith.constant 0 : i32
    %c0_i32_1 = arith.constant 0 : i32
    return %arg0, %c0_i32, %c0_i32_0 : i32, i32, i32
  }
}

</mosaic_0001>

<bundles_post_ra>
// kernel: tpu_custom_call.1
= control target key start
LH: loop header
LB: loop body
LE: loop exit
PB: predicated region body
PF: predicated region fallthrough
CT: control target
= control target key end

     0   :  { %8 = vsyncpa [#allocation3], 0  ;;  %s1594_s0 = inlined_call_operand.vmem [shape: f32[2,4,290], index: 0, kind: input, shape index: {}]   ;;  %s1595_s1 = inlined_call_operand.vmem [shape: f32[9,8,4], index: 1, kind: input, shape index: {}]   ;;  %s1596_s2 = inlined_call_operand.vmem [shape: f32[8,1], index: 2, kind: input, shape index: {}]   ;;  %s1597_s3 = inlined_call_operand.hbm [shape: f32[2,8,256], index: 3, kind: output, shape index: {}]  }
   0x1   :  { %10 = vsyncpa [#allocation3 + $0x1], 0  ;;  %s1373_s12 = smov 0   ;;  %s1375_s13 = smov 0  }
   0x2   :  { %s1377_s14 = smov 0   ;;  %s1379_s15 = smov 0  }
   0x3 LB: > { %s1394_s16 = sadd.s32 4294967295, %s1340_s15   ;;  %s1181_s17 = sadd.s32 4294967294, %s1340_s15   ;;  %s1340_s15 = sphi %s1379_s15, %s1611_s15   ;;  %s1336_s14 = sphi %s1377_s14, %s1610_s14   ;;  %s1332_s13 = sphi %s1375_s13, %s1609_s13   ;;  %s1328_s12 = sphi %s1373_s12, %s1608_s12  }
   0x4   : > { %s1398_s18 = sadd.s32 1, %s1340_s15   ;;  %s91_s19 = sadd.s32 1, %s1336_s14 }
   0x5   : > { %s88_s20 = ssub.s32 %s1340_s15, %s1398_s18  ;;  %p101_p0 = scmp.ne.s32.totalorder %s1336_s14, %s1332_s13 }
   0x6   : > { %p89_p1 = scmp.eq.s32.totalorder %s88_s20, 0  ;;  %p102_p2 = scmp.eq.s32.totalorder %s1394_s16, 1 }
   0x7   : > { %p107_p3 = scmp.ne.s32.totalorder %s1332_s13, %s1328_s12  ;;  %p108_p4 = scmp.eq.s32.totalorder %s1181_s17, 1 }
   0x8   : > { %s1409_s21 = scalar_select %p89_p1, %s1336_s14, %s91_s19  }
   0x9   : > { %p1411_p5 = por %p102_p2, %p101_p0  ;;  %p1415_p6 = por %p108_p4, %p107_p3 }
   0xa   : > { %p1184_p7 = scmp.ge.s32.totalorder %s1340_s15, 1  ;;  %p140_p8 = scmp.lt.s32.totalorder %s1340_s15, 3 }
   0xc   : > { %p141_p9 = pnand %p1184_p7, %p140_p8 }
   0xd   : > { %p164_p10 = scmp.lt.s32.totalorder (!%p141_p9), %s1394_s16, 1  ;;  %s1343_s29 = smov (!%p141_p9), 127  }
   0xe   : > { %144 = sbr.rel (%p141_p9) target bundleno = 400 (0x190), region = 32  ;;  %s1344_s5 = smov (!%p141_p9), 126  }
   0xf   : > { %s1345_s6 = smov (!%p141_p9), 112   ;;  %s1346_s7 = smov (!%p141_p9), 111  }
  0x10   : > { %s1347_s8 = smov (!%p141_p9), 110   ;;  %s1348_s9 = smov (!%p141_p9), 96  }
  0x11   : > { %s1349_s10 = smov (!%p141_p9), 95   ;;  %s1351_s11 = smov (!%p141_p9), 94  }
  0x12   : > { %s161_s17 = sand.u32 (!%p141_p9), 1, %s1332_s13   ;;  %s1227_s20 = sshll.u32 (!%p141_p9), %s1394_s16, 8 }
  0x13   : > { %v175_v0 = vlaneseq  ;;  %s165_s24 = scalar_select %p164_p10, %s1394_s16, 1  ;;  %v1342_v4 = vmov 0.0   ;;  %vm225_vm2 = vcmask 1043456   ;;  %v220_v14 = vld [vmem:[%s1595_s1] sm:$0xff]  ;;  %vm221_vm3 = vcmask 31744   ;;  %v1190_v35 = vld [vmem:[%s1595_s1 + $0x8] sm:$0xff] }
  0x14   : > { %296 = vmatprep.mubr.f32.mxu0 %v1342_v4  ;;  %392 = vmatprep.mubr.f32.mxu1 %v1342_v4  ;;  %v1350_v20 = vmov 0   ;;  %v169_v22 = vld [vmem:[%s1596_s2] sm:$0xff]  ;;  %vm412_vm4 = vcmask 1031168   ;;  %vm318_vm5 = vcmask 1039360   ;;  %vm514_vm8 = vcmask 916480   ;;  %v1194_v38 = vld [vmem:[%s1595_s1 + $0x10] sm:$0xff] }
  0x15   : > { %v1423_v1 = vand.u32 127, %v175_v0  ;;  %s1228_s25 = smul.u32 12, %s165_s24  ;;  %1278 = vset.pattern.permute.xlu0 %v1350_v20  ;;  %v1198_v46 = vld [vmem:[%s1595_s1 + $0x18] sm:$0xff]  ;;  %vm618_vm9 = vcmask 908288   ;;  %v1202_v52 = vld [vmem:[%s1595_s1 + $0x20] sm:$0xff]  ;;  %vm712_vm10 = vcmask 900096  }
  0x16   : > { %v1206_v60 = vld [vmem:[%s1595_s1 + $0x28] sm:$0xff]  ;;  %vm814_vm11 = vcmask 785408   ;;  %vm918_vm12 = vcmask 777216   ;;  %vm1012_vm13 = vcmask 769024   ;;  %s1185_s19 = sshll.u32 %s161_s17, 4  ;;  %s1352_s4 = smov [#allocation2]  }
  0x17   : > { %v1426_v2 = vadd.s32 128, %v1423_v1  ;;  %v182_v3 = vand.u32 15, %v1423_v1  ;;  %s1434_s28 = scalar_lea.vmem %s1594_s0, %s1228_s25  ;;  %s163_s24 = scalar_lea.vmem [#allocation2], %s1185_s19 }
  0x18   : > { %v306_v6 = vld [vmem:[%s1434_s28 + $0x8] sm:$0xf]  ;;  %v305_v7 = vld [vmem:[%s1434_s28] sm:$0xff]  ;;  %s1122_s25 = sshll.u32 %s163_s24, 4  ;;  %s1284_s16 = sshll.u32 %s1352_s4, 4  ;;  %s1123_s25 = int_to_ptr.vmem [resolvable:$true] %s1122_s25  ;;  %s1285_s16 = int_to_ptr.vmem [resolvable:$false] %s1284_s16 }
  0x19   : > { %v189_v5 = vand.u32 15, %v1426_v2  ;;  %vm1441_vm0 = vcmp.ge.s32.totalorder %v182_v3, 1  ;;  %316 = vrot.lane.b32.xlu0 %v306_v6, %s1343_s29  ;;  %312 = vrot.lane.b32.xlu1 %v305_v7, %s1343_s29  ;;  %v311_v9 = vcombine.high %v305_v7, %v305_v7  ;;  %v402_v11 = vld [vmem:[%s1434_s28 + $0x8] sm:$0xf]  ;;  %vm1474_vm6 = vcmp.lt.s32.totalorder %v182_v3, 15  ;;  %s1280_s30 = scalar_lea.vmem %s1123_s25, 256  ;;  %p1287_p0 = scmp.lt.s32.totalorder %s1123_s25, %s1285_s16 }
  0x1a   : > { %v218_v13 = vsel %vm1441_vm0, %v305_v7, 0.0  ;;  %v504_v15 = vld [vmem:[%s1434_s28 + $0x8] sm:$0xf]  ;;  %p1281_p11 = scmp.ne.s32.totalorder %s1123_s25, %s1280_s30 }
  0x1b   : > { %vm1447_vm1 = vcmp.ge.s32.totalorder %v189_v5, 1  ;;  %v606_v16 = vld [vmem:[%s1434_s28 + $0x8] sm:$0xf]  ;;  %vm1480_vm7 = vcmp.lt.s32.totalorder %v189_v5, 15  ;;  %v1210_v5 = vld [vmem:[%s1595_s1 + $0x30] sm:$0xff] }
  0x1c   : > { %v219_v12 = vsel %vm1447_vm1, %v311_v9, 0.0  ;;  %v702_v17 = vld [vmem:[%s1434_s28 + $0x8] sm:$0xf]  ;;  %p1282_p12 = pnand %p1281_p11, %p1411_p5 }
  0x1d   : > { %1187 = vmatprep.subr.msk.mxu0 %vm225_vm2, %v219_v12  ;;  %410 = vrot.lane.b32.xlu0 %v402_v11, %s1344_s5  ;;  %v804_v18 = vld [vmem:[%s1434_s28 + $0x8] sm:$0xf]  ;;  %v1214_v11 = vld [vmem:[%s1595_s1 + $0x38] sm:$0xff] }
  0x1e   : > { %406 = vrot.lane.b32.xlu1 %v305_v7, %s1344_s5  ;;  %1188 = vmatpush1.msk.msra.mxu0 %vm225_vm2, %v218_v13  ;;  %v906_v19 = vld [vmem:[%s1434_s28 + $0x8] sm:$0xf]  ;;  %p1283_p13 = pneg %p1282_p12 }
  0x1f   : > { %1189 = vmatmul.mubr.msk.f32.vlgmr.msra.gmra.mxu0 %vm221_vm3, %v220_v14  ;;  %v1002_v21 = vld [vmem:[%s1434_s28 + $0x8] sm:$0xf]  ;;  %s1120_s28 = scalar_lea.hbm %s1597_s3, %s1227_s20 }
  0x20   : > { %494 = vmatprep.mubr.f32.mxu0 %v1342_v4 }
  0x21   : > { %314 = vrot.lane.b32.xlu0 %v311_v9, %s1343_s29  ;;  %s1108_s29 = scalar_lea.sflag [#allocation3], %s161_s17 }
  0x22   : > { %408 = vrot.lane.b32.xlu1 %v311_v9, %s1344_s5  ;;  %s1286_s5 = scalar_lea.vmem %s1285_s16, 512 }
  0x23   : > { %p1288_p1 = scmp.lt.s32.totalorder %s1286_s5, %s1280_s30 }
  0x25   : > { %510 = vrot.lane.b32.xlu0 %v311_v9, %s1345_s6  ;;  %p1289_p2 = por %p1288_p1, %p1287_p0 }
  0x26   : > { %512 = vrot.lane.b32.xlu1 %v504_v15, %s1345_s6 }
  0x27   : > { %p1290_p3 = pnand %p1289_p2, %p1283_p13 }
  0x29   : > { %508 = vrot.lane.b32.xlu0 %v305_v7, %s1345_s6 }
  0x2a   : > { %614 = vrot.lane.b32.xlu1 %v311_v9, %s1346_s7 }
  0x2d   : > { %616 = vrot.lane.b32.xlu0 %v606_v16, %s1346_s7 }
  0x2e   : > { %612 = vrot.lane.b32.xlu1 %v305_v7, %s1346_s7 }
  0x31   : > { %708 = vrot.lane.b32.xlu0 %v311_v9, %s1347_s8 }
  0x32   : > { %710 = vrot.lane.b32.xlu1 %v702_v17, %s1347_s8 }
  0x35   : > { %706 = vrot.lane.b32.xlu0 %v305_v7, %s1347_s8 }
  0x36   : > { %810 = vrot.lane.b32.xlu1 %v311_v9, %s1348_s9 }
  0x39   : > { %812 = vrot.lane.b32.xlu0 %v804_v18, %s1348_s9  ;;  %v1218_v18 = vld [vmem:[%s1595_s1 + $0x40] sm:$0xff] }
  0x3a   : > { %808 = vrot.lane.b32.xlu1 %v305_v7, %s1348_s9 }
  0x3d   : > { %914 = vrot.lane.b32.xlu0 %v311_v9, %s1349_s10 }
  0x3e   : > { %916 = vrot.lane.b32.xlu1 %v906_v19, %s1349_s10 }
  0x41   : > { %912 = vrot.lane.b32.xlu0 %v305_v7, %s1349_s10 }
  0x42   : > { %1008 = vrot.lane.b32.xlu1 %v311_v9, %s1351_s11 }
  0x45   : > { %1010 = vrot.lane.b32.xlu0 %v1002_v21, %s1351_s11 }
  0x46   : > { %1006 = vrot.lane.b32.xlu1 %v305_v7, %s1351_s11 }
  0x49   : > { %172 = vperm.xlu0 %1278, %v169_v22  }
  0x8b   : > { %v317_v23 = vpop.permute.xlu0 %316  ;;  %v313_v24 = vpop.permute.xlu1 %312 }
  0x8f   : > { %v411_v25 = vpop.permute.xlu0 %410 }
  0x90   : > { %v407_v26 = vpop.permute.xlu1 %406 }
  0x93   : > { %v315_v30 = vpop.permute.xlu0 %314 }
  0x94   : > { %v409_v29 = vpop.permute.xlu1 %408  ;;  %v320_v33 = vsel %vm318_vm5, %v315_v30, %v317_v23  ;;  %v319_v34 = vsel %vm318_vm5, %v313_v24, %v315_v30 }
  0x95   : > { %v413_v31 = vsel %vm412_vm4, %v407_v26, %v409_v29  ;;  %v414_v32 = vsel %vm412_vm4, %v409_v29, %v411_v25  ;;  %1191 = vmatprep.subr.msk.mxu1 %vm225_vm2, %v320_v33 }
  0x96   : > { %v417_v36 = vsel %vm1474_vm6, %v413_v31, 0.0  ;;  %v418_v37 = vsel %vm1480_vm7, %v414_v32, 0.0  ;;  %1192 = vmatpush1.msk.msra.mxu1 %vm225_vm2, %v319_v34 }
  0x97   : > { %1195 = vmatprep.subr.msk.mxu0 %vm225_vm2, %v418_v37  ;;  %v511_v40 = vpop.permute.xlu0 %510  ;;  %1193 = vmatmul.mubr.msk.f32.vlgmr.msra.gmra.mxu1 %vm221_vm3, %v1190_v35 }
  0x98   : > { %v513_v39 = vpop.permute.xlu1 %512  ;;  %1196 = vmatpush1.msk.msra.mxu0 %vm225_vm2, %v417_v36  ;;  %596 = vmatprep.mubr.f32.mxu1 %v1342_v4 }
  0x99   : > { %v516_v41 = vsel %vm514_vm8, %v511_v40, %v513_v39  ;;  %1197 = vmatmul.mubr.msk.f32.vlgmr.msra.gmra.mxu0 %vm221_vm3, %v1194_v38 }
  0x9a   : > { %v520_v42 = vsel %vm1447_vm1, %v516_v41, 0.0  ;;  %692 = vmatprep.mubr.f32.mxu0 %v1342_v4 }
  0x9b   : > { %1199 = vmatprep.subr.msk.mxu1 %vm225_vm2, %v520_v42  ;;  %v509_v44 = vpop.permute.xlu0 %508 }
  0x9c   : > { %v615_v43 = vpop.permute.xlu1 %614  ;;  %v515_v45 = vsel %vm514_vm8, %v509_v44, %v511_v40 }
  0x9d   : > { %v519_v47 = vsel %vm1441_vm0, %v515_v45, 0.0 }
  0x9e   : > { %1200 = vmatpush1.msk.msra.mxu1 %vm225_vm2, %v519_v47 }
  0x9f   : > { %v617_v49 = vpop.permute.xlu0 %616  ;;  %1201 = vmatmul.mubr.msk.f32.vlgmr.msra.gmra.mxu1 %vm221_vm3, %v1198_v46 }
  0xa0   : > { %v613_v48 = vpop.permute.xlu1 %612  ;;  %v620_v51 = vsel %vm618_vm9, %v615_v43, %v617_v49  ;;  %794 = vmatprep.mubr.f32.mxu1 %v1342_v4 }
  0xa1   : > { %v619_v50 = vsel %vm618_vm9, %v613_v48, %v615_v43  ;;  %1203 = vmatprep.subr.msk.mxu0 %vm225_vm2, %v620_v51 }
  0xa2   : > { %1204 = vmatpush1.msk.msra.mxu0 %vm225_vm2, %v619_v50 }
  0xa3   : > { %v709_v54 = vpop.permute.xlu0 %708  ;;  %1205 = vmatmul.mubr.msk.f32.vlgmr.msra.gmra.mxu0 %vm221_vm3, %v1202_v52 }
  0xa4   : > { %v711_v53 = vpop.permute.xlu1 %710  ;;  %896 = vmatprep.mubr.f32.mxu0 %v1342_v4 }
  0xa5   : > { %v714_v55 = vsel %vm712_vm10, %v709_v54, %v711_v53 }
  0xa6   : > { %v718_v56 = vsel %vm1480_vm7, %v714_v55, 0.0 }
  0xa7   : > { %1207 = vmatprep.subr.msk.mxu1 %vm225_vm2, %v718_v56  ;;  %v707_v58 = vpop.permute.xlu0 %706 }
  0xa8   : > { %v811_v57 = vpop.permute.xlu1 %810  ;;  %v713_v59 = vsel %vm712_vm10, %v707_v58, %v709_v54 }
  0xa9   : > { %v717_v61 = vsel %vm1474_vm6, %v713_v59, 0.0 }
  0xaa   : > { %1208 = vmatpush1.msk.msra.mxu1 %vm225_vm2, %v717_v61 }
  0xab   : > { %v813_v63 = vpop.permute.xlu0 %812  ;;  %1209 = vmatmul.mubr.msk.f32.vlgmr.msra.gmra.mxu1 %vm221_vm3, %v1206_v60 }
  0xac   : > { %v809_v62 = vpop.permute.xlu1 %808  ;;  %v816_v1 = vsel %vm814_vm11, %v811_v57, %v813_v63  ;;  %992 = vmatprep.mubr.f32.mxu1 %v1342_v4 }
  0xad   : > { %v815_v0 = vsel %vm814_vm11, %v809_v62, %v811_v57  ;;  %v820_v3 = vsel %vm1447_vm1, %v816_v1, 0.0 }
  0xae   : > { %v819_v2 = vsel %vm1441_vm0, %v815_v0, 0.0  ;;  %1211 = vmatprep.subr.msk.mxu0 %vm225_vm2, %v820_v3 }
  0xaf   : > { %v915_v7 = vpop.permute.xlu0 %914  ;;  %1212 = vmatpush1.msk.msra.mxu0 %vm225_vm2, %v819_v2 }
  0xb0   : > { %v917_v6 = vpop.permute.xlu1 %916  ;;  %1213 = vmatmul.mubr.msk.f32.vlgmr.msra.gmra.mxu0 %vm221_vm3, %v1210_v5 }
  0xb1   : > { %v920_v9 = vsel %vm918_vm12, %v915_v7, %v917_v6  ;;  %1094 = vmatprep.mubr.f32.mxu0 %v1342_v4 }
  0xb2   : > { %1215 = vmatprep.subr.msk.mxu1 %vm225_vm2, %v920_v9 }
  0xb3   : > { %v913_v10 = vpop.permute.xlu0 %912 }
  0xb4   : > { %v1009_v8 = vpop.permute.xlu1 %1008  ;;  %v919_v12 = vsel %vm918_vm12, %v913_v10, %v915_v7 }
  0xb5   : > { %1216 = vmatpush1.msk.msra.mxu1 %vm225_vm2, %v919_v12 }
  0xb6   : > { %1217 = vmatmul.mubr.msk.f32.vlgmr.msra.gmra.mxu1 %vm221_vm3, %v1214_v11 }
  0xb7   : > { %v1011_v14 = vpop.permute.xlu0 %1010 }
  0xb8   : > { %v1007_v13 = vpop.permute.xlu1 %1006  ;;  %v1014_v16 = vsel %vm1012_vm13, %v1009_v8, %v1011_v14 }
  0xb9   : > { %v1013_v15 = vsel %vm1012_vm13, %v1007_v13, %v1009_v8  ;;  %v1018_v4 = vsel %vm1480_vm7, %v1014_v16, 0.0 }
  0xba   : > { %v1017_v17 = vsel %vm1474_vm6, %v1013_v15, 0.0  ;;  %1219 = vmatprep.subr.msk.mxu0 %vm225_vm2, %v1018_v4 }
  0xbb   : > { %1220 = vmatpush1.msk.msra.mxu0 %vm225_vm2, %v1017_v17 }
  0xbc   : > { %1221 = vmatmul.mubr.msk.f32.vlgmr.msra.gmra.mxu0 %vm221_vm3, %v1218_v18 }
  0xc4   : > { %v173_v20 = vpop.permute.xlu0 %172 }
  0xdf   : > { %v298_v19 = vpop.f32.mrf.mxu0 }
  0xe0   : > { %v303_v21 = vadd.f32 %v298_v19, %v173_v20 }
  0xe1   : > { %v300_v23 = vpop.f32.mrf.mxu0 }
  0xe2   : > { %v304_v24 = vadd.f32 %v300_v23, %v173_v20 }
 0x157   : > { %v394_v22 = vpop.f32.mrf.mxu1 }
 0x158   : > { %v399_v25 = vadd.f32 %v394_v22, %v303_v21 }
 0x159   : > { %v396_v26 = vpop.f32.mrf.mxu1  ;;  %v496_v27 = vpop.f32.mrf.mxu0 }
 0x15a   : > { %v400_v28 = vadd.f32 %v396_v26, %v304_v24  ;;  %v501_v29 = vadd.f32 %v496_v27, %v399_v25 }
 0x15b   : > { %v498_v30 = vpop.f32.mrf.mxu0 }
 0x15c   : > { %v502_v32 = vadd.f32 %v498_v30, %v400_v28 }
 0x15f   : > { %v598_v31 = vpop.f32.mrf.mxu1 }
 0x160   : > { %v603_v33 = vadd.f32 %v598_v31, %v501_v29 }
 0x161   : > { %v600_v34 = vpop.f32.mrf.mxu1 }
 0x162   : > { %v604_v36 = vadd.f32 %v600_v34, %v502_v32 }
 0x163   : > { %v694_v35 = vpop.f32.mrf.mxu0 }
 0x164   : > { %v699_v37 = vadd.f32 %v694_v35, %v603_v33 }
 0x165   : > { %v696_v38 = vpop.f32.mrf.mxu0 }
 0x166   : > { %v700_v40 = vadd.f32 %v696_v38, %v604_v36 }
 0x16b   : > { %v796_v39 = vpop.f32.mrf.mxu1 }
 0x16c   : > { %v801_v41 = vadd.f32 %v796_v39, %v699_v37 }
 0x16d   : > { %v798_v42 = vpop.f32.mrf.mxu1 }
 0x16e   : > { %v802_v44 = vadd.f32 %v798_v42, %v700_v40 }
 0x170   : > { %v898_v43 = vpop.f32.mrf.mxu0 }
 0x171   : > { %v903_v45 = vadd.f32 %v898_v43, %v801_v41 }
 0x172   : > { %v900_v46 = vpop.f32.mrf.mxu0 }
 0x173   : > { %v904_v48 = vadd.f32 %v900_v46, %v802_v44 }
 0x176   : > { %v994_v47 = vpop.f32.mrf.mxu1 }
 0x177   : > { %v999_v49 = vadd.f32 %v994_v47, %v903_v45 }
 0x178   : > { %v996_v50 = vpop.f32.mrf.mxu1 }
 0x179   : > { %v1000_v52 = vadd.f32 %v996_v50, %v904_v48 }
 0x17c   : > { %v1096_v51 = vpop.f32.mrf.mxu0 }
 0x17d   : > { %v1101_v53 = vadd.f32 %v1096_v51, %v999_v49 }
 0x17e   : > { %v1098_v54 = vpop.f32.mrf.mxu0 }
 0x17f   : > { %v1103_v55 = vmax.f32 %v1101_v53, 0.0  ;;  %v1102_v56 = vadd.f32 %v1098_v54, %v1000_v52 }
 0x181   : > { %1105 = vst [vmem:[%s163_s24] sm:$0xff] %v1103_v55  ;;  %v1104_v57 = vmax.f32 %v1102_v56, 0.0 }
 0x183   : > { %1106 = vst [vmem:[%s163_s24 + $0x8] sm:$0xff] %v1104_v57 }
 0x184   : > { %1293 = shalt.err (!%p1290_p3)
}
 0x185   : > { %s1294_s6 = scalar_lea.hbm %s1120_s28, 256  ;;  %s1298_s9 = scalar_lea.hbm %s1597_s3, 512 }
 0x186   : > { %p1295_p4 = scmp.ne.s32.totalorder %s1120_s28, %s1294_s6  ;;  %p1299_p9 = scmp.lt.s32.totalorder %s1120_s28, %s1597_s3 }
 0x187   : > { %p1300_p10 = scmp.lt.s32.totalorder %s1298_s9, %s1294_s6 }
 0x188   : > { %p1296_p7 = pnand %p1295_p4, %p1411_p5 }
 0x189   : > { %p1301_p11 = por %p1300_p10, %p1299_p9 }
 0x18a   : > { %p1297_p8 = pneg %p1296_p7 }
 0x18c   : > { %p1302_p12 = pnand %p1301_p11, %p1297_p8 }
 0x18e   : > { %1305 = shalt.err (!%p1302_p12)
}
 0x18f   : > { %1229 = dma.vmem_to_hbm [thread:$0]  (%p1411_p5), %s1123_s25, 256, %s1120_s28, %s1108_s29  }
 0x190 PF: > { %p1235_p13 = scmp.ge.s32.totalorder %s1340_s15, 2  ;;  %s1134_s17 = sand.u32 1, %s1328_s12  }
 0x191   : > { %s1135_s19 = scalar_lea.sflag [#allocation3], %s1134_s17 }
 0x192   : > { %p1232_p0 = pnand %p1235_p13, %p1415_p6 }
 0x194   : > { %p1233_p1 = pneg %p1232_p0 }
 0x196   : > { %1323 = dma.done.wait (%p1233_p1), %s1135_s19, 256  }
 0x197   : > { %1325 = vsyncadd (%p1233_p1), %s1135_s19, 4294967040  ;;  %p13_p2 = scmp.ge.s32.totalorder %s1398_s18, 4   ;;  %s1608_s12 = smov %s1332_s13 }
 0x198   : > { %s1609_s13 = smov %s1336_s14  ;;  %s1610_s14 = smov %s1409_s21 }
 0x199   : > { %s1611_s15 = smov %s1398_s18  ;;  %15 = sbr.rel (!%p13_p2) target bundleno = 3 (0x3), region = 75 }
 0x19e   :  { %1140 = vsyncpa [#allocation3], 1 }
 0x19f   :  { %1142 = vsyncpa [#allocation3 + $0x1], 1 }

</bundles_post_ra>
